<compile_context>
chip_gen: v5e
topology: v5e:2x2
jax: 0.10.0
libtpu: 0.0.40
codegen_flags: <defaults>
</compile_context>

<pallas_src>
import math

import jax
import jax.numpy as jnp
from jax.experimental import pallas as pl
from jax.experimental.pallas import tpu as pltpu

# ----------------------------- configuration -------------------------------
B = 8              # demo batch
D = 32             # input_dim (== time_dim)
HALF = D // 2      # half of the time embedding
HID = 4 * D        # hidden width of the MLP
LOG_MAX_TS = math.log(10000.0)
MAX_TILE_B = 1024  # batch rows per grid step (review: 1024-2048)


# ------------------------------- kernel ------------------------------------
def flow_kernel(x_ref, t_ref, scales_ref, w1_ref, b12_ref, w2_ref, w3_ref,
                b3_ref, o_ref):
    x = x_ref[...]                                  # (TB, D)    f32
    t = t_ref[...]                                  # (TB, 1)    f32

    # time embedding: args = t * scales, sin/cos on the EUP (all f32)
    args = t * scales_ref[...]                      # (TB, HALF)
    xt = jnp.concatenate([x, jnp.sin(args), jnp.cos(args)], axis=-1)  # (TB,2D)

    b1 = b12_ref[0:1, :]                            # (1, HID) f32
    b2 = b12_ref[1:2, :]                            # (1, HID) f32

    # layer 1: single fused K=2D dot, bf16 operands, f32 accumulation
    h1 = jnp.dot(xt.astype(jnp.bfloat16), w1_ref[...],
                 preferred_element_type=jnp.float32) + b1
    h1 = jnp.maximum(h1, 0.0)

    # layer 2
    h2 = jnp.dot(h1.astype(jnp.bfloat16), w2_ref[...],
                 preferred_element_type=jnp.float32) + b2
    h2 = jnp.maximum(h2, 0.0)

    # layer 3 (output)
    o_ref[...] = (jnp.dot(h2.astype(jnp.bfloat16), w3_ref[...],
                          preferred_element_type=jnp.float32)
                  + b3_ref[...])


# -------------------------- one-time param prep -----------------------------
def prepare_params(params):
    """PyTorch-layout params -> kernel-layout params (call once, reuse)."""
    w1, b1, w2, b2, w3, b3 = params                 # w: (out, in), b: (out,)
    w1_t = jnp.asarray(w1).T.astype(jnp.bfloat16)   # (2D, HID) rows=[x|sin|cos]
    w2_t = jnp.asarray(w2).T.astype(jnp.bfloat16)   # (HID, HID)
    w3_t = jnp.asarray(w3).T.astype(jnp.bfloat16)   # (HID, D)
    b12 = jnp.stack([jnp.asarray(b1, jnp.float32),
                     jnp.asarray(b2, jnp.float32)], axis=0)        # (2, HID)
    b3r = jnp.asarray(b3, jnp.float32).reshape(1, -1)              # (1, D)
    scales = jnp.exp(jnp.arange(HALF, dtype=jnp.float32)
                     * (-(LOG_MAX_TS / (HALF - 1)))).reshape(1, HALF)
    return (w1_t, b12, w2_t, w3_t, b3r, scales)


# ----------------------------- tile selection --------------------------------
def _round_up(v, m):
    return ((v + m - 1) // m) * m


def _choose_tile(batch):
    """Batch-rows per grid step.  Gives >= 2 grid steps for mid-sized batches
    so the 'parallel' axis can shard across the two v7x TensorCores."""
    if batch <= 8:
        return 8
    if batch <= 2 * MAX_TILE_B:
        return min(_round_up(pl.cdiv(batch, 2), 8), MAX_TILE_B)
    return MAX_TILE_B


# ------------------------------ wrapper --------------------------------------
def flow_matching_forward(x, t, prepared):
    """x: (B, D) f32, t: (B,) f32, prepared = prepare_params(...) -> (B, D)."""
    w1_t, b12, w2_t, w3_t, b3r, scales = prepared
    batch = x.shape[0]

    x = x.astype(jnp.float32)
    t2 = t.reshape(-1, 1).astype(jnp.float32)       # (B, 1)

    tb = _choose_tile(batch)
    nb = pl.cdiv(batch, tb)                         # ragged final block is OK:
                                                    # OOB rows masked on writeback

    matmul_elems = 2 * D * HID + HID * HID + HID * D
    cost = pl.CostEstimate(
        flops=2 * batch * matmul_elems,
        transcendentals=batch * D,                  # sin + cos (HALF each)
        bytes_accessed=(batch * D * 4 + batch * 4 + batch * D * 4
                        + matmul_elems * 2          # bf16 weights
                        + (2 * HID + D + HALF) * 4))

    out = pl.pallas_call(
        flow_kernel,
        out_shape=jax.ShapeDtypeStruct((batch, D), jnp.float32),
        grid=(nb,),
        in_specs=[
            pl.BlockSpec((tb, D), lambda i: (i, 0)),        # x tile
            pl.BlockSpec((tb, 1), lambda i: (i, 0)),        # t tile
            pl.BlockSpec((1, HALF), lambda i: (0, 0)),      # scales (resident)
            pl.BlockSpec((2 * D, HID), lambda i: (0, 0)),   # w1 bf16 (resident)
            pl.BlockSpec((2, HID), lambda i: (0, 0)),       # b1/b2 packed f32
            pl.BlockSpec((HID, HID), lambda i: (0, 0)),     # w2 bf16 (resident)
            pl.BlockSpec((HID, D), lambda i: (0, 0)),       # w3 bf16 (resident)
            pl.BlockSpec((1, D), lambda i: (0, 0)),         # b3 f32
        ],
        out_specs=pl.BlockSpec((tb, D), lambda i: (i, 0)),
        compiler_params=pltpu.CompilerParams(
            dimension_semantics=("parallel",)),
        cost_estimate=cost,
    )(x, t2, scales, w1_t, b12, w2_t, w3_t, b3r)

    return out


flow_matching_forward_jit = jax.jit(flow_matching_forward)


# ----------------------------- pure-JAX ref ---------------------------------
def reference_forward(x, t, params):
    w1, b1, w2, b2, w3, b3 = params
    scales = jnp.exp(jnp.arange(HALF, dtype=jnp.float32)
                     * (-(LOG_MAX_TS / (HALF - 1))))
    args = t.reshape(-1, 1) * scales[None, :]
    te = jnp.concatenate([jnp.sin(args), jnp.cos(args)], axis=1)
    x_t = jnp.concatenate([x, te], axis=1)
    h = jnp.maximum(x_t @ w1.T + b1, 0.0)
    h = jnp.maximum(h @ w2.T + b2, 0.0)
    return h @ w3.T + b3


# --------------------------------- main --------------------------------------
if __name__ == "__main__":
    key = jax.random.PRNGKey(0)
    kx, kt, k1, k2, k3, k4, k5, k6, kx2, kt2 = jax.random.split(key, 10)

    # deterministic synthetic parameters (PyTorch nn.Linear layout: (out, in))
    def init(k, shape, fan_in):
        bound = 1.0 / math.sqrt(fan_in)
        return jax.random.uniform(k, shape, jnp.float32, -bound, bound)

    w1 = init(k1, (HID, 2 * D), 2 * D)
    b1 = init(k2, (HID,), 2 * D)
    w2 = init(k3, (HID, HID), HID)
    b2 = init(k4, (HID,), HID)
    w3 = init(k5, (D, HID), HID)
    b3 = init(k6, (D,), HID)
    params = (w1, b1, w2, b2, w3, b3)

    # one-time parameter preparation (transposes / bf16 cast / bias packing)
    prepared = jax.tree_util.tree_map(jax.block_until_ready,
                                      prepare_params(params))

    # case 1: demo batch (B=8, exact tile)
    x = jax.random.normal(kx, (B, D), jnp.float32)
    t = jax.random.uniform(kt, (B,), jnp.float32)
    out = jax.block_until_ready(flow_matching_forward_jit(x, t, prepared))
    ref = reference_forward(x, t, params)
    assert out.shape == (B, D)
    assert jnp.allclose(out, ref, atol=3e-2, rtol=3e-2), "mismatch vs reference"

    # case 2: non-divisible batch -> exercises the ragged final block path
    # (verifies out-of-bounds rows are masked on writeback, per review)
    B2 = 13
    x2 = jax.random.normal(kx2, (B2, D), jnp.float32)
    t2 = jax.random.uniform(kt2, (B2,), jnp.float32)
    out2 = jax.block_until_ready(flow_matching_forward_jit(x2, t2, prepared))
    ref2 = reference_forward(x2, t2, params)
    assert out2.shape == (B2, D)
    assert jnp.allclose(out2, ref2, atol=3e-2, rtol=3e-2), "ragged mismatch"

    print("KERNEL_OK")
</pallas_src>

<mosaic_0001>
module attributes {stable_mosaic.version = 11 : i64} {
  func.func @flow_kernel(%arg0: i32, %arg1: memref<8x32xf32, #tpu.memory_space<vmem>>, %arg2: memref<8x1xf32, #tpu.memory_space<vmem>>, %arg3: memref<1x16xf32, #tpu.memory_space<vmem>>, %arg4: memref<64x128xbf16, #tpu.memory_space<vmem>>, %arg5: memref<2x128xf32, #tpu.memory_space<vmem>>, %arg6: memref<128x128xbf16, #tpu.memory_space<vmem>>, %arg7: memref<128x32xbf16, #tpu.memory_space<vmem>>, %arg8: memref<1x32xf32, #tpu.memory_space<vmem>>, %arg9: memref<8x32xf32, #tpu.memory_space<vmem>>) attributes {dimension_semantics = [#tpu.dimension_semantics<parallel>], iteration_bounds = array<i64: 1>, scalar_prefetch = 0 : i64, scratch_operands = 0 : i64, tpu.core_type = #tpu.core_type<tc>, window_params = [{transform_indices = @transform_0, window_bounds = array<i64: 8, 32>}, {transform_indices = @transform_1, window_bounds = array<i64: 8, 1>}, {pipeline_mode = #tpu.pipeline_mode<synchronous>, transform_indices = @transform_2, window_bounds = array<i64: 1, 16>}, {pipeline_mode = #tpu.pipeline_mode<synchronous>, transform_indices = @transform_3, window_bounds = array<i64: 64, 128>}, {pipeline_mode = #tpu.pipeline_mode<synchronous>, transform_indices = @transform_4, window_bounds = array<i64: 2, 128>}, {pipeline_mode = #tpu.pipeline_mode<synchronous>, transform_indices = @transform_5, window_bounds = array<i64: 128, 128>}, {pipeline_mode = #tpu.pipeline_mode<synchronous>, transform_indices = @transform_6, window_bounds = array<i64: 128, 32>}, {pipeline_mode = #tpu.pipeline_mode<synchronous>, transform_indices = @transform_7, window_bounds = array<i64: 1, 32>}, {transform_indices = @transform_8, window_bounds = array<i64: 8, 32>}]} {
    %c0 = arith.constant 0 : index
    %c0_0 = arith.constant 0 : index
    %0 = vector.load %arg1[%c0, %c0_0] : memref<8x32xf32, #tpu.memory_space<vmem>>, vector<8x32xf32>
    %c0_1 = arith.constant 0 : index
    %c0_2 = arith.constant 0 : index
    %1 = vector.load %arg2[%c0_1, %c0_2] : memref<8x1xf32, #tpu.memory_space<vmem>>, vector<8x1xf32>
    %c0_3 = arith.constant 0 : index
    %c0_4 = arith.constant 0 : index
    %2 = vector.load %arg3[%c0_3, %c0_4] : memref<1x16xf32, #tpu.memory_space<vmem>>, vector<1x16xf32>
    %3 = vector.broadcast %1 : vector<8x1xf32> to vector<8x16xf32>
    %4 = vector.broadcast %2 : vector<1x16xf32> to vector<8x16xf32>
    %5 = arith.mulf %3, %4 : vector<8x16xf32>
    %6 = math.sin %5 : vector<8x16xf32>
    %7 = math.cos %5 : vector<8x16xf32>
    %8 = tpu.concatenate %0, %6, %7 in 1 : vector<8x32xf32>, vector<8x16xf32>, vector<8x16xf32> -> vector<8x64xf32>
    %c0_5 = arith.constant 0 : index
    %c0_6 = arith.constant 0 : index
    %9 = vector.load %arg5[%c0_5, %c0_6] : memref<2x128xf32, #tpu.memory_space<vmem>>, vector<1x128xf32>
    %c1 = arith.constant 1 : index
    %c0_7 = arith.constant 0 : index
    %10 = vector.load %arg5[%c1, %c0_7] : memref<2x128xf32, #tpu.memory_space<vmem>>, vector<1x128xf32>
    %11 = arith.truncf %8 : vector<8x64xf32> to vector<8x64xbf16>
    %c0_8 = arith.constant 0 : index
    %c0_9 = arith.constant 0 : index
    %12 = vector.load %arg4[%c0_8, %c0_9] : memref<64x128xbf16, #tpu.memory_space<vmem>>, vector<64x128xbf16>
    %cst = arith.constant dense<0.000000e+00> : vector<8x128xf32>
    %13 = tpu.matmul %11, %12, %cst {dimension_numbers = #tpu.dot_dimension_numbers<[1], [0], [0], [1], [0, 0, 1, 1], [], []>} : vector<8x64xbf16>, vector<64x128xbf16>, vector<8x128xf32> -> vector<8x128xf32>
    %14 = vector.broadcast %9 : vector<1x128xf32> to vector<8x128xf32>
    %15 = arith.addf %13, %14 : vector<8x128xf32>
    %cst_10 = arith.constant 0.000000e+00 : f32
    %16 = vector.broadcast %cst_10 : f32 to vector<8x128xf32>
    %17 = arith.maximumf %15, %16 : vector<8x128xf32>
    %18 = arith.truncf %17 : vector<8x128xf32> to vector<8x128xbf16>
    %c0_11 = arith.constant 0 : index
    %c0_12 = arith.constant 0 : index
    %19 = vector.load %arg6[%c0_11, %c0_12] : memref<128x128xbf16, #tpu.memory_space<vmem>>, vector<128x128xbf16>
    %cst_13 = arith.constant dense<0.000000e+00> : vector<8x128xf32>
    %20 = tpu.matmul %18, %19, %cst_13 {dimension_numbers = #tpu.dot_dimension_numbers<[1], [0], [0], [1], [0, 0, 1, 1], [], []>} : vector<8x128xbf16>, vector<128x128xbf16>, vector<8x128xf32> -> vector<8x128xf32>
    %21 = vector.broadcast %10 : vector<1x128xf32> to vector<8x128xf32>
    %22 = arith.addf %20, %21 : vector<8x128xf32>
    %cst_14 = arith.constant 0.000000e+00 : f32
    %23 = vector.broadcast %cst_14 : f32 to vector<8x128xf32>
    %24 = arith.maximumf %22, %23 : vector<8x128xf32>
    %25 = arith.truncf %24 : vector<8x128xf32> to vector<8x128xbf16>
    %c0_15 = arith.constant 0 : index
    %c0_16 = arith.constant 0 : index
    %26 = vector.load %arg7[%c0_15, %c0_16] : memref<128x32xbf16, #tpu.memory_space<vmem>>, vector<128x32xbf16>
    %cst_17 = arith.constant dense<0.000000e+00> : vector<8x32xf32>
    %27 = tpu.matmul %25, %26, %cst_17 {dimension_numbers = #tpu.dot_dimension_numbers<[1], [0], [0], [1], [0, 0, 1, 1], [], []>} : vector<8x128xbf16>, vector<128x32xbf16>, vector<8x32xf32> -> vector<8x32xf32>
    %c0_18 = arith.constant 0 : index
    %c0_19 = arith.constant 0 : index
    %28 = vector.load %arg8[%c0_18, %c0_19] : memref<1x32xf32, #tpu.memory_space<vmem>>, vector<1x32xf32>
    %29 = vector.broadcast %28 : vector<1x32xf32> to vector<8x32xf32>
    %30 = arith.addf %27, %29 : vector<8x32xf32>
    %c0_20 = arith.constant 0 : index
    %c0_21 = arith.constant 0 : index
    %31 = vector.load %arg9[%c0_20, %c0_21] : memref<8x32xf32, #tpu.memory_space<vmem>>, vector<8x32xf32>
    tpu.vector_store %arg9[%c0_20, %c0_21], %30 {strides = array<i32>} : memref<8x32xf32, #tpu.memory_space<vmem>>, vector<8x32xf32>,
    return
  }
  func.func @transform_0(%arg0: i32) -> (i32, i32) {
    %c0_i32 = arith.constant 0 : i32
    %c0_i32_0 = arith.constant 0 : i32
    return %arg0, %c0_i32 : i32, i32
  }
  func.func @transform_1(%arg0: i32) -> (i32, i32) {
    %c0_i32 = arith.constant 0 : i32
    %c0_i32_0 = arith.constant 0 : i32
    return %arg0, %c0_i32 : i32, i32
  }
  func.func @transform_2(%arg0: i32) -> (i32, i32) {
    %c0_i32 = arith.constant 0 : i32
    %c0_i32_0 = arith.constant 0 : i32
    %c0_i32_1 = arith.constant 0 : i32
    return %c0_i32, %c0_i32_0 : i32, i32
  }
  func.func @transform_3(%arg0: i32) -> (i32, i32) {
    %c0_i32 = arith.constant 0 : i32
    %c0_i32_0 = arith.constant 0 : i32
    %c0_i32_1 = arith.constant 0 : i32
    return %c0_i32, %c0_i32_0 : i32, i32
  }
  func.func @transform_4(%arg0: i32) -> (i32, i32) {
    %c0_i32 = arith.constant 0 : i32
    %c0_i32_0 = arith.constant 0 : i32
    %c0_i32_1 = arith.constant 0 : i32
    return %c0_i32, %c0_i32_0 : i32, i32
  }
  func.func @transform_5(%arg0: i32) -> (i32, i32) {
    %c0_i32 = arith.constant 0 : i32
    %c0_i32_0 = arith.constant 0 : i32
    %c0_i32_1 = arith.constant 0 : i32
    return %c0_i32, %c0_i32_0 : i32, i32
  }
  func.func @transform_6(%arg0: i32) -> (i32, i32) {
    %c0_i32 = arith.constant 0 : i32
    %c0_i32_0 = arith.constant 0 : i32
    %c0_i32_1 = arith.constant 0 : i32
    return %c0_i32, %c0_i32_0 : i32, i32
  }
  func.func @transform_7(%arg0: i32) -> (i32, i32) {
    %c0_i32 = arith.constant 0 : i32
    %c0_i32_0 = arith.constant 0 : i32
    %c0_i32_1 = arith.constant 0 : i32
    return %c0_i32, %c0_i32_0 : i32, i32
  }
  func.func @transform_8(%arg0: i32) -> (i32, i32) {
    %c0_i32 = arith.constant 0 : i32
    %c0_i32_0 = arith.constant 0 : i32
    return %arg0, %c0_i32 : i32, i32
  }
}

</mosaic_0001>

<bundles_post_ra>
// kernel: flow_matching_forward.1
= control target key start
LH: loop header
LB: loop body
LE: loop exit
PB: predicated region body
PF: predicated region fallthrough
CT: control target
= control target key end

     0   :  { %13 = vsyncpa [#allocation3], 0  ;;  %s982_s0 = inlined_call_operand.vmem [shape: f32[8,32], index: 0, kind: input, shape index: {}]   ;;  %s983_s1 = inlined_call_operand.vmem [shape: f32[8,1], index: 1, kind: input, shape index: {}]   ;;  %s984_s2 = inlined_call_operand.vmem [shape: f32[1,16], index: 2, kind: input, shape index: {}]   ;;  %s985_s3 = inlined_call_operand.hbm [shape: bf16[64,128], index: 3, kind: input, shape index: {}]   ;;  %s986_s4 = inlined_call_operand.vmem [shape: f32[2,128], index: 4, kind: input, shape index: {}]   ;;  %s987_s5 = inlined_call_operand.vmem [shape: bf16[128,128], index: 5, kind: input, shape index: {}]   ;;  %s988_s6 = inlined_call_operand.vmem [shape: bf16[128,32], index: 6, kind: input, shape index: {}]   ;;  %s989_s7 = inlined_call_operand.vmem [shape: f32[1,32], index: 7, kind: input, shape index: {}]   ;;  %s990_s8 = inlined_call_operand.hbm [shape: f32[8,32], index: 8, kind: output, shape index: {}]  }
   0x1   :  { %14 = vsyncpa [#allocation4], 0  ;;  %s25_s29 = sshll.u32 %s985_s3, 4  ;;  %s791_s30 = smov [#allocation2]   ;;  %s26_s29 = int_to_ptr.hbm [resolvable:$true] %s25_s29 }
   0x2   :  { %s27_s9 = sshll.u32 %s791_s30, 4  ;;  %s792_s10 = smov 64   ;;  %s28_s9 = int_to_ptr.vmem [resolvable:$true] %s27_s9 }
   0x3   :  { %s793_s11 = smov 4  }
   0x4   :  { %33 = dma.hbm_to_vmem [thread:$0]  %s26_s29, 512, %s28_s9, [#allocation3], %s792_s10, %s792_s10, %s793_s11  }
   0x5   :  { %787 = dma.done.wait [#allocation3], 512  }
   0x6   :  { %788 = vsyncadd [#allocation3], 4294966784  ;;  %v794_v0 = vmov 0   ;;  %v48_v1 = vld [vmem:[%s983_s1] sm:$0xff]  ;;  %v795_v16 = vmov 2102212464  }
   0x7   :  { %734 = vset.pattern.permute.xlu0 %v794_v0  ;;  %v735_v2 = vld [vmem:[%s984_s2] ss:$0 sm:$0xff]  ;;  %v796_v18 = vmov 920167782   ;;  %v797_v21 = vmov 1326507024  }
   0x8   :  { %52 = vperm.xlu0 %734, %v48_v1   ;;  %v798_v23 = vmov 683565275   ;;  %v799_v25 = vmov 2475754826   ;;  %v800_v28 = vmov 2131351028  }
   0x9   :  { %s801_s1 = smov 48   ;;  %s802_s2 = smov 32  }
   0xa   :  { %s803_s28 = smov [#allocation5]  }
   0xb   :  { %s602_s29 = sshll.u32 %s803_s28, 4  ;;  %s603_s29 = int_to_ptr.vmem [resolvable:$true] %s602_s29 }
  0x7a   :  { %v53_v3 = vpop.permute.xlu0 %52 }
  0x7b   :  { %v859_v4 = vmul.f32 %v735_v2, %v53_v3 }
  0x7d   :  { %v62_v5 = vand.u32 2139095040, %v859_v4  ;;  %v59_v8 = vand.u32 2147483647, %v859_v4  ;;  %vm61_vm12 = vcmp.lt.s32.totalorder %v859_v4, 0 }
  0x7f   :  { %v63_v6 = vshrl.u32 %v62_v5, 23  ;;  %v66_v10 = vand.u32 8388607, %v59_v8  ;;  %vm60_vm13 = vcmp.le.f32.partialorder %v59_v8, 0.7853982 }
  0x81   :  { %v614_v7 = vadd.s32 4294967169, %v63_v6  ;;  %v67_v14 = vor.u32 8388608, %v66_v10 }
  0x83   :  { %v69_v9 = vadd.s32 1, %v614_v7  ;;  %v874_v35 = vshll.u32 %v67_v14, 8 }
  0x85   :  { %vm70_vm0 = vcmp.gt.s32.totalorder %v69_v9, 0  ;;  %v108_v45 = vand.u32 65535, %v874_v35  ;;  %v109_v47 = vshrl.u32 %v874_v35, 16 }
  0x86   :  { %v71_v11 = vsel %vm70_vm0, %v69_v9, 0 }
  0x87   :  { %v73_v12 = vand.u32 31, %v71_v11  ;;  %v867_v15 = vshrl.u32 %v71_v11, 5 }
  0x89   :  { %v865_v13 = vsub.s32 32, %v73_v12  ;;  %v85_v17 = vshll.u32 %v795_v16, %v73_v12  ;;  %v88_v19 = vshll.u32 %v796_v18, %v73_v12  ;;  %v76_v24 = vshll.u32 %v798_v23, %v73_v12 }
  0x8a   :  { %v79_v27 = vshll.u32 %v799_v25, %v73_v12  ;;  %v82_v30 = vshll.u32 %v800_v28, %v73_v12  ;;  %vm94_vm1 = vcmp.lt.s32.totalorder %v867_v15, 4  ;;  %vm91_vm2 = vcmp.lt.s32.totalorder %v867_v15, 1 }
  0x8b   :  { %v86_v20 = vshrl.u32 %v796_v18, %v865_v13  ;;  %v89_v22 = vshrl.u32 %v797_v21, %v865_v13  ;;  %v77_v26 = vshrl.u32 %v799_v25, %v865_v13  ;;  %v80_v29 = vshrl.u32 %v800_v28, %v865_v13 }
  0x8c   :  { %v83_v31 = vshrl.u32 %v795_v16, %v865_v13  ;;  %vm93_vm3 = vcmp.lt.s32.totalorder %v867_v15, 3  ;;  %vm92_vm4 = vcmp.lt.s32.totalorder %v867_v15, 2  ;;  %v75_v9 = vshrl.u32 %v798_v23, %v865_v13 }
  0x8d   :  { %v87_v32 = vor.u32 %v86_v20, %v85_v17  ;;  %v90_v33 = vor.u32 %v89_v22, %v88_v19  ;;  %v78_v34 = vor.u32 %v77_v26, %v76_v24  ;;  %v81_v36 = vor.u32 %v80_v29, %v79_v27 }
  0x8e   :  { %v84_v37 = vor.u32 %v83_v31, %v82_v30 }
  0x8f   :  { %v100_v38 = vsel %vm94_vm1, %v87_v32, 920167782  ;;  %v104_v39 = vsel %vm94_vm1, %v90_v33, 1326507024  ;;  %v99_v40 = vsel %vm91_vm2, %v78_v34, %v81_v36  ;;  %v95_v17 = vsel %vm91_vm2, %v75_v9, %v78_v34 }
  0x90   :  { %v101_v41 = vsel %vm93_vm3, %v84_v37, %v100_v38  ;;  %v103_v42 = vsel %vm91_vm2, %v81_v36, %v84_v37  ;;  %v105_v44 = vsel %vm93_vm3, %v87_v32, %v104_v39  ;;  %v96_v5 = vsel %vm94_vm1, %v84_v37, 2102212464 }
  0x91   :  { %v102_v43 = vsel %vm92_vm4, %v99_v40, %v101_v41  ;;  %v106_v46 = vsel %vm92_vm4, %v103_v42, %v105_v44  ;;  %v97_v18 = vsel %vm93_vm3, %v81_v36, %v96_v5 }
  0x92   :  { %v132_v48 = vand.u32 65535, %v102_v43  ;;  %v133_v49 = vshrl.u32 %v102_v43, 16  ;;  %v110_v50 = vand.u32 65535, %v106_v46  ;;  %v111_v51 = vshrl.u32 %v106_v46, 16 }
  0x93   :  { %v98_v23 = vsel %vm92_vm4, %v95_v17, %v97_v18  ;;  %vm202_vm4 = vweird.f32 %v859_v4 }
  0x94   :  { %v135_v52 = vmul.u32 %v133_v49, %v108_v45  ;;  %v136_v53 = vmul.u32 %v132_v48, %v109_v47  ;;  %v113_v54 = vmul.u32 %v111_v51, %v108_v45  ;;  %v114_v55 = vmul.u32 %v110_v50, %v109_v47 }
  0x95   :  { %v134_v56 = vmul.u32 %v132_v48, %v108_v45  ;;  %v112_v58 = vmul.u32 %v110_v50, %v108_v45  ;;  %v137_v60 = vmul.u32 %v133_v49, %v109_v47  ;;  %v115_v61 = vmul.u32 %v111_v51, %v109_v47  ;;  %v704_v47 = vld [vmem:[#allocation2 + $0x18] sm:$0xff]  ;;  %v703_v49 = vld [vmem:[#allocation2 + $0x10] sm:$0xff] }
  0x96   :  { %v138_v57 = vshll.u32 %v135_v52, 16  ;;  %v116_v59 = vshll.u32 %v113_v54, 16  ;;  %v140_v62 = vshll.u32 %v136_v53, 16  ;;  %v118_v1 = vshll.u32 %v114_v55, 16  ;;  %424 = vmatpush.bf16.msra.mxu0 %v704_v47 }
  0x97   :  { %v139_v14 = vshrl.u32 %v135_v52, 16  ;;  %v117_v19 = vshrl.u32 %v113_v54, 16  ;;  %v141_v21 = vshrl.u32 %v136_v53, 16  ;;  %v119_v24 = vshrl.u32 %v114_v55, 16  ;;  %v702_v53 = vld [vmem:[#allocation2 + $0x8] sm:$0xff] }
  0x98   :  { %vm142_vm5 = vc.u32 %v134_v56, %v138_v57  ;;  %v144_v63 = vadd.s32 %v138_v57, %v134_v56  ;;  %vm120_vm6 = vc.u32 %v112_v58, %v116_v59  ;;  %v122_v2 = vadd.s32 %v116_v59, %v112_v58 }
  0x99   :  { %v143_v3 = vsel %vm142_vm5, 1, %v794_v0  ;;  %v121_v6 = vsel %vm120_vm6, 1, %v794_v0  ;;  %v152_v28 = vmul.u32 %v874_v35, %v98_v23  ;;  %vm376_vm5 = vcmask 261120  }
  0x9a   :  { %v145_v7 = vadd.s32 %v143_v3, %v137_v60  ;;  %vm146_vm7 = vc.u32 %v144_v63, %v140_v62  ;;  %v123_v10 = vadd.s32 %v121_v6, %v115_v61  ;;  %vm124_vm8 = vc.u32 %v122_v2, %v118_v1  ;;  %425 = vmatpush.bf16.msra.mxu0 %v703_v49 }
  0x9b   :  { %v147_v11 = vsel %vm146_vm7, 1, %v794_v0  ;;  %v125_v12 = vsel %vm124_vm8, 1, %v794_v0  ;;  %v148_v0 = vadd.s32 %v144_v63, %v140_v62  ;;  %vm378_vm6 = vcmask 392192  }
  0x9c   :  { %v149_v16 = vadd.s32 %v147_v11, %v145_v7  ;;  %v127_v20 = vadd.s32 %v125_v12, %v123_v10  ;;  %vm416_vm7 = vcmask 523264  }
  0x9e   :  { %v150_v22 = vadd.s32 %v149_v16, %v139_v14  ;;  %v128_v13 = vadd.s32 %v127_v20, %v117_v19  ;;  %426 = vmatpush.bf16.msra.mxu0 %v702_v53 }
  0xa0   :  { %v151_v25 = vadd.s32 %v150_v22, %v141_v21  ;;  %v129_v26 = vadd.s32 %v128_v13, %v119_v24 }
  0xa2   :  { %v155_v27 = vadd.s32 1, %v151_v25  ;;  %vm154_vm9 = vc.u32 %v129_v26, %v148_v0  ;;  %v153_v40 = vadd.s32 %v148_v0, %v129_v26  ;;  %v701_v26 = vld [vmem:[#allocation2] sm:$0xff]  ;;  %v712_v0 = vld [vmem:[%s987_s5 + $0x38] sm:$0xff] }
  0xa3   :  { %427 = vmatpush.bf16.msra.mxu0 %v701_v26  ;;  %500 = vmatpush.bf16.msra.mxu1 %v712_v0 }
  0xa4   :  { %v156_v29 = vsel %vm154_vm9, %v155_v27, %v151_v25  ;;  %v711_v27 = vld [vmem:[%s987_s5 + $0x30] sm:$0xff] }
  0xa5   :  { %v157_v30 = vadd.s32 %v156_v29, %v152_v28  ;;  %v709_v28 = vld [vmem:[%s987_s5 + $0x20] sm:$0xff]  ;;  %v708_v29 = vld [vmem:[%s987_s5 + $0x18] sm:$0xff] }
  0xa7   :  { %v158_v31 = vadd.s32 536870912, %v157_v30  ;;  %501 = vmatpush.bf16.msra.mxu1 %v711_v27 }
  0xa9   :  { %v159_v32 = vshrl.u32 %v158_v31, 30  ;;  %v47_v31 = vld [vmem:[%s982_s0] sm:$0xff] }
  0xab   :  { %v160_v33 = vshll.u32 %v159_v32, 30  ;;  %v183_v56 = vsub.s32 4, %v159_v32 }
  0xad   :  { %v161_v34 = vsub.s32 %v157_v30, %v160_v33  ;;  %v184_v61 = vsel %vm61_vm12, %v183_v56, %v159_v32  ;;  %v707_v30 = vld [vmem:[%s987_s5 + $0x10] sm:$0xff] }
  0xae   :  { %v186_v1 = vsel %vm60_vm13, 0, %v184_v61 }
  0xaf   :  { %vm162_vm10 = vcmp.lt.s32.totalorder %v161_v34, 0  ;;  %v163_v36 = vsub.s32 0, %v161_v34  ;;  %v203_v7 = vadd.s32 3, %v186_v1  ;;  %v358_v12 = vand.u32 3, %v186_v1 }
  0xb1   :  { %v164_v37 = vsel %vm162_vm10, %v163_v36, %v161_v34  ;;  %v204_v14 = vand.u32 3, %v203_v7  ;;  %vm359_vm14 = vcmp.lt.s32.totalorder %v358_v12, 2  ;;  %vm360_vm15 = vcmp.eq.s32.totalorder %v358_v12, 0 }
  0xb2   :  { %v165_v38 = vclz %v164_v37  ;;  %vm363_vm0 = vcmp.eq.s32.totalorder %v358_v12, 2 }
  0xb3   :  { %vm205_vm1 = vcmp.lt.s32.totalorder %v204_v14, 2  ;;  %vm206_vm2 = vcmp.eq.s32.totalorder %v204_v14, 0  ;;  %vm209_vm3 = vcmp.eq.s32.totalorder %v204_v14, 2 }
  0xb4   :  { %v615_v39 = vadd.s32 4294967294, %v165_v38  ;;  %v706_v38 = vld [vmem:[%s987_s5 + $0x8] sm:$0xff] }
  0xb6   :  { %vm616_vm11 = vcmp.lt.s32.totalorder %v615_v39, 0 }
  0xb7   :  { %v168_v15 = vsel %vm616_vm11, 0, %v615_v39  ;;  %v705_v39 = vld [vmem:[%s987_s5] sm:$0xff] }
  0xb8   :  { %v169_v41 = vsub.s32 32, %v168_v15  ;;  %v173_v42 = vsub.s32 4294967266, %v168_v15  ;;  %v170_v43 = vshll.u32 %v161_v34, %v168_v15  ;;  %v720_v15 = vld [vmem:[%s988_s6 + $0x38] sm:$0xff] }
  0xb9   :  { %583 = vmatpush.bf16.msra.mxu2 %v720_v15 }
  0xba   :  { %v171_v44 = vshrl.u32 %v153_v40, %v169_v41  ;;  %v174_v35 = vadd.s32 127, %v173_v42  ;;  %v719_v40 = vld [vmem:[%s988_s6 + $0x30] sm:$0xff]  ;;  %v718_v41 = vld [vmem:[%s988_s6 + $0x28] sm:$0xff]  ;;  %v717_v42 = vld [vmem:[%s988_s6 + $0x20] sm:$0xff] }
  0xbc   :  { %v172_v45 = vor.u32 %v171_v44, %v170_v43  ;;  %v175_v46 = vshll.u32 %v174_v35, 23  ;;  %v716_v43 = vld [vmem:[%s988_s6 + $0x18] sm:$0xff]  ;;  %v715_v44 = vld [vmem:[%s988_s6 + $0x10] sm:$0xff]  ;;  %v736_v35 = vld [vmem:[%s986_s4] ss:$0 sm:$0xff] }
  0xbd   :  { %584 = vmatpush.bf16.msra.mxu2 %v719_v40 }
  0xbe   :  { %v176_v48 = vor.u32 4788187, %v175_v46  ;;  %v179_v51 = vcvt.s32.f32 %v172_v45 }
  0xc0   :  { %v177_v50 = vand.u32 2147483647, %v176_v48 }
  0xc1   :  { %585 = vmatpush.bf16.msra.mxu2 %v718_v41 }
  0xc2   :  { %v180_v52 = vmul.f32 %v179_v51, %v177_v50  ;;  %v714_v50 = vld [vmem:[%s988_s6 + $0x8] sm:$0xff]  ;;  %v713_v51 = vld [vmem:[%s988_s6] sm:$0xff]  ;;  %s604_s6 = sshll.u32 %s990_s8, 4  ;;  %s605_s6 = int_to_ptr.hbm [resolvable:$true] %s604_s6 }
  0xc4   :  { %v181_v54 = vxor.u32 2147483648, %v180_v52 }
  0xc5   :  { %586 = vmatpush.bf16.msra.mxu2 %v717_v42 }
  0xc6   :  { %v182_v55 = vsel %vm61_vm12, %v181_v54, %v180_v52  ;;  %v737_v52 = vld [vmem:[%s986_s4 + $0x1] ss:$0 sm:$0xff] }
  0xc7   :  { %v185_v57 = vsel %vm60_vm13, %v859_v4, %v182_v55  ;;  %v710_v4 = vld [vmem:[%s987_s5 + $0x28] sm:$0xff] }
  0xc8   :  { %v187_v58 = vmul.f32 %v185_v57, %v185_v57  ;;  %502 = vmatpush.bf16.msra.mxu1 %v710_v4 }
  0xc9   :  { %587 = vmatpush.bf16.msra.mxu2 %v716_v43 }
  0xca   :  { %v188_v59 = vmul.f32 -0.001358992, %v187_v58  ;;  %v195_v60 = vmul.f32 -0.00019511016, %v187_v58 }
  0xcc   :  { %v189_v62 = vadd.f32 0.041655596, %v188_v59  ;;  %v196_v63 = vadd.f32 0.008332121, %v195_v60  ;;  %503 = vmatpush.bf16.msra.mxu1 %v709_v28 }
  0xcd   :  { %588 = vmatpush.bf16.msra.mxu2 %v715_v44 }
  0xce   :  { %v190_v2 = vmul.f32 %v189_v62, %v187_v58  ;;  %v197_v3 = vmul.f32 %v196_v63, %v187_v58 }
  0xd0   :  { %v191_v5 = vadd.f32 -0.4999988, %v190_v2  ;;  %v198_v6 = vadd.f32 -0.16666654, %v197_v3  ;;  %504 = vmatpush.bf16.msra.mxu1 %v708_v29 }
  0xd1   :  { %589 = vmatpush.bf16.msra.mxu2 %v714_v50 }
  0xd2   :  { %v192_v9 = vmul.f32 %v191_v5, %v187_v58  ;;  %v199_v10 = vmul.f32 %v198_v6, %v187_v58  ;;  %v738_v58 = vld [vmem:[%s989_s7] ss:$0 sm:$0xff] }
  0xd4   :  { %v193_v8 = vadd.f32 1.0, %v192_v9  ;;  %v200_v11 = vadd.f32 1.0, %v199_v10  ;;  %505 = vmatpush.bf16.msra.mxu1 %v707_v30 }
  0xd5   :  { %590 = vmatpush.bf16.msra.mxu2 %v713_v51 }
  0xd6   :  { %v201_v16 = vmul.f32 %v200_v11, %v185_v57  ;;  %v210_v17 = vxor.u32 2147483648, %v193_v8 }
  0xd8   :  { %v207_v18 = vxor.u32 2147483648, %v201_v16  ;;  %v365_v20 = vsel %vm363_vm0, %v210_v17, %v201_v16  ;;  %v211_v22 = vsel %vm209_vm3, %v210_v17, %v201_v16  ;;  %506 = vmatpush.bf16.msra.mxu1 %v706_v38 }
  0xda   :  { %v362_v19 = vsel %vm360_vm15, %v193_v8, %v207_v18  ;;  %v208_v21 = vsel %vm206_vm2, %v193_v8, %v207_v18 }
  0xdb   :  { %v366_v24 = vsel %vm359_vm14, %v362_v19, %v365_v20  ;;  %v212_v13 = vsel %vm205_vm1, %v208_v21, %v211_v22 }
  0xdc   :  { %v367_v23 = vsel %vm202_vm4, nan, %v366_v24  ;;  %v213_v25 = vsel %vm202_vm4, nan, %v212_v13  ;;  %507 = vmatpush.bf16.msra.mxu1 %v705_v39 }
  0xdd   :  { %373 = vrot.lane.b32.xlu1 %v367_v23, %s801_s1  ;;  %369 = vrot.lane.b32.xlu0 %v213_v25, %s802_s2 }
 0x14f   :  { %v374_v32 = vpop.permute.xlu1 %373  ;;  %v370_v33 = vpop.permute.xlu0 %369 }
 0x150   :  { %v377_v34 = vsel %vm376_vm5, %v47_v31, %v370_v33 }
 0x151   :  { %v379_v36 = vsel %vm378_vm6, %v377_v34, %v374_v32 }
 0x152   :  { %v382_v37 = vpack.c.bf16 %v379_v36, %v379_v36 }
 0x154   :  { %636 = vmatmul.msk.bf16.vlgmr.msra.gmra.mxu0 %vm416_vm7, %v382_v37 }
 0x1d1   :  { %v429_v45 = vpop.f32.mrf.mxu0 }
 0x1d2   :  { %v430_v46 = vadd.f32 %v736_v35, %v429_v45 }
 0x1d4   :  { %v433_v47 = vmax.f32 %v430_v46, 0.0 }
 0x1d6   :  { %v434_v48 = vpack.c.bf16 %v433_v47, %v433_v47 }
 0x1d8   :  { %508 = vmatmul.bf16.vlgmr.msra.gmra.mxu1 %v434_v48 }
 0x1d9   :  { %v431_v49 = vpop.f32.mrf.mxu0 }
 0x255   :  { %v509_v53 = vpop.f32.mrf.mxu1 }
 0x256   :  { %v510_v54 = vadd.f32 %v737_v52, %v509_v53 }
 0x258   :  { %v513_v55 = vmax.f32 %v510_v54, 0.0 }
 0x25a   :  { %v514_v56 = vpack.c.bf16 %v513_v55, %v513_v55 }
 0x25c   :  { %591 = vmatmul.bf16.vlgmr.msra.gmra.mxu2 %v514_v56 }
 0x25d   :  { %v511_v57 = vpop.f32.mrf.mxu1 }
 0x2df   :  { %v592_v59 = vpop.f32.mrf.mxu2 }
 0x2e0   :  { %v593_v60 = vadd.f32 %v738_v58, %v592_v59 }
 0x2e2   :  { %596 = vst.msk [vmem:[#allocation5] sm:$0xff] %vm376_vm5, %v593_v60 }
 0x2e3   :  { %607 = dma.vmem_to_hbm [thread:$0]  %s603_s29, 128, %s605_s6, [#allocation4]  }
 0x2e7   :  { %v594_v61 = vpop.f32.mrf.mxu2 }
 0x2e8   :  { %789 = dma.done.wait [#allocation4], 128  }
 0x2e9   :  { %790 = vsyncadd [#allocation4], 4294967168 }
 0x2ea   :  { %612 = vsyncpa [#allocation3], 1 }
 0x2eb   :  { %613 = vsyncpa [#allocation4], 1 }

</bundles_post_ra>
